<compile_context>
chip_gen: v7x
topology: tpu7x:2x2x1
jax: 0.10.0
libtpu: 0.0.40
codegen_flags: <defaults>
</compile_context>

<pallas_src>
import math

import jax
import jax.numpy as jnp
from jax.experimental import pallas as pl
from jax.experimental.pallas import tpu as pltpu


def kgc_kernel(q_ref, k_ref, v_ref, r_ref, w_ref, b_ref, o_ref):
    """One batch tile per grid step; rows are flattened (batch, value) pairs.

    q_ref: (M, D) bf16 (query repeated per value row)
    k_ref/r_ref: (N, M, D) bf16, neighbor-major     v_ref: (M, D) bf16
    w_ref: (2D, O) bf16     b_ref: (1, O) f32       o_ref: (M, O) f32
    """
    N = k_ref.shape[0]
    D = q_ref.shape[-1]

    q = q_ref[...].astype(jnp.float32)  # (M, D)

    # Attention logits per neighbor: reduce q * rel over D (lane axis).
    # TODO(synk): kernel is HBM-bound; if VPU/XLU ever binds, repack k/r lane-dense
    # as (M, N*D) slabs and use segmented reductions instead of per-n cross-lane sums.
    logits = [
        jnp.sum(q * r_ref[n].astype(jnp.float32), axis=-1, keepdims=True)  # (M, 1)
        for n in range(N)
    ]

    # Numerically stable softmax over the neighbor axis (dim=2 of the torch module).
    m = logits[0]
    for l in logits[1:]:
        m = jnp.maximum(m, l)
    es = [jnp.exp(l - m) for l in logits]
    denom = es[0]
    for e in es[1:]:
        denom = denom + e
    inv = pl.reciprocal(denom, approx=True)  # EUP slot; normalization factored out below.
    # TODO(synk): dropout / dropout_attn are identity (p=0.0 / eval mode); omitted.

    # Weighted sum over neighbors (f32 VALU accumulation: v5e-safe).
    # TODO(synk): on v6e/v7x this loop could accumulate in bf16 for 2x VALU throughput.
    attn = es[0] * k_ref[0].astype(jnp.float32)
    for n in range(1, N):
        attn = attn + es[n] * k_ref[n].astype(jnp.float32)
    attn = attn * inv  # (M, D)

    # 'cat' aggregation + Linear + ReLU as two accumulated bf16 MXU matmuls on
    # sublane-aligned weight-row slices (no VMEM concat round-trip).
    out = jnp.dot(attn.astype(jnp.bfloat16), w_ref[0:D, :],
                  preferred_element_type=jnp.float32)
    out = out + jnp.dot(v_ref[...], w_ref[D:2 * D, :],
                        preferred_element_type=jnp.float32)
    out = out + b_ref[...]
    o_ref[...] = jnp.maximum(out, 0.0)


def kgc_forward(queries, keys, values, relations, w_t, bias, *, block_batch=256):
    """queries [B, D], keys/relations [B, V*N, D], values [B, V, D] -> [B, V, O]."""
    B, V, D = values.shape
    N = keys.shape[1] // V
    O = w_t.shape[1]

    # Batch tile: M = bt*V rows per step must be a multiple of 16 so the bf16
    # q/k/v/r blocks hit native (16, 128) tiling (and 8 for the f32 output block).
    bt_align = 16 // math.gcd(V, 16)
    bt = max(1, min(block_batch, B))
    bt = ((bt + bt_align - 1) // bt_align) * bt_align
    n_tiles = -(-B // bt)
    # Megacore (v7x): prefer >= 2 grid steps so the "parallel" axis can split across TCs.
    if n_tiles == 1 and bt > bt_align:
        half = -(-B // 2)
        bt = ((half + bt_align - 1) // bt_align) * bt_align
        n_tiles = -(-B // bt)
    B_pad = n_tiles * bt
    pad = B_pad - B
    M = bt * V

    # ---- wrapper-side layout plumbing (plain XLA ops; a producer would emit these) ----
    # Neighbor-major keys/relations: element [n, b*V + v, d] == keys[b, v*N + n, d].
    k_nm = jnp.transpose(keys.reshape(B, V, N, D), (2, 0, 1, 3)).reshape(N, B * V, D)
    r_nm = jnp.transpose(relations.reshape(B, V, N, D), (2, 0, 1, 3)).reshape(N, B * V, D)
    v_fl = values.reshape(B * V, D)
    q_rep = jnp.repeat(queries, V, axis=0)  # (B*V, D): query broadcast per value row.
    # TODO(synk): pass queries un-repeated as a (bt, D) block and replicate along the
    # sublane axis in-kernel once the (bt, V, D)->(M, D) Mosaic collapse is verified.

    if pad:
        k_nm = jnp.pad(k_nm, ((0, 0), (0, pad * V), (0, 0)))
        r_nm = jnp.pad(r_nm, ((0, 0), (0, pad * V), (0, 0)))
        v_fl = jnp.pad(v_fl, ((0, pad * V), (0, 0)))
        q_rep = jnp.pad(q_rep, ((0, pad * V), (0, 0)))

    # bf16 HBM storage for the bandwidth-dominant tensors (f32 upcast / bf16 MXU in-kernel).
    k_nm = k_nm.astype(jnp.bfloat16)
    r_nm = r_nm.astype(jnp.bfloat16)
    v_fl = v_fl.astype(jnp.bfloat16)
    q_rep = q_rep.astype(jnp.bfloat16)
    w_bf = w_t.astype(jnp.bfloat16)                 # (2D, O): MXU-native weight
    b_f32 = bias.astype(jnp.float32).reshape(1, O)  # tiny; keep f32 for the epilogue add

    out_flat = pl.pallas_call(
        kgc_kernel,
        out_shape=jax.ShapeDtypeStruct((B_pad * V, O), jnp.float32),
        grid_spec=pltpu.PrefetchScalarGridSpec(
            num_scalar_prefetch=0,
            grid=(n_tiles,),
            in_specs=[
                pl.BlockSpec((M, D), lambda i: (i, 0)),        # queries (repeated), bf16
                pl.BlockSpec((N, M, D), lambda i: (0, i, 0)),  # keys, neighbor-major, bf16
                pl.BlockSpec((M, D), lambda i: (i, 0)),        # values, bf16
                pl.BlockSpec((N, M, D), lambda i: (0, i, 0)),  # relations, neighbor-major, bf16
                pl.BlockSpec((2 * D, O), lambda i: (0, 0)),    # fc weight, bf16, resident
                pl.BlockSpec((1, O), lambda i: (0, 0)),        # fc bias, f32, resident
            ],
            # Unpadded O columns (legal: equals the full array dim) -> 4x less write traffic.
            out_specs=pl.BlockSpec((M, O), lambda i: (i, 0)),
        ),
        compiler_params=pltpu.CompilerParams(dimension_semantics=("parallel",)),
    )(q_rep, k_nm, v_fl, r_nm, w_bf, b_f32)

    out = out_flat.reshape(B_pad, V, O)
    return out[:B] if pad else out


def kgc_reference(queries, keys, values, relations, w_t, bias):
    B, V, D = values.shape
    N = keys.shape[1] // V
    q = queries.reshape(B, 1, 1, D)
    k = keys.reshape(B, V, N, D)
    r = relations.reshape(B, V, N, D)
    logits = jnp.sum(q * r, axis=3)
    probs = jax.nn.softmax(logits, axis=2)[..., None]
    outputs = jnp.sum(probs * k, axis=2)
    cat = jnp.concatenate([outputs, values], axis=2)
    return jax.nn.relu(cat @ w_t + bias)


if __name__ == "__main__":
    B, V, N, D, O = 6, 8, 4, 32, 32

    key = jax.random.PRNGKey(0)
    kq, kk, kv, kr, kw = jax.random.split(key, 5)

    queries = jax.random.normal(kq, (B, D), dtype=jnp.float32)
    keys = jax.random.normal(kk, (B, V * N, D), dtype=jnp.float32)
    values = jax.random.normal(kv, (B, V, D), dtype=jnp.float32)
    relations = jax.random.normal(kr, (B, V * N, D), dtype=jnp.float32)

    # fc: Linear(2*D, O), xavier_uniform with gain = calculate_gain('relu') = sqrt(2), zero bias.
    fan_in, fan_out = 2 * D, O
    bound = math.sqrt(2.0) * math.sqrt(6.0 / (fan_in + fan_out))
    # Stored already transposed: [2*D, O] so the kernel does x @ W.
    w_t = jax.random.uniform(kw, (2 * D, O), jnp.float32, minval=-bound, maxval=bound)
    bias = jnp.zeros((O,), jnp.float32)

    # Small block_batch so the demo exercises multiple grid steps and batch padding.
    out = kgc_forward(queries, keys, values, relations, w_t, bias, block_batch=4)
    jax.block_until_ready(out)
    assert out.shape == (B, V, O)

    # Reference consumes the same bf16-rounded q/k/v/r/w the kernel sees; remaining
    # differences are op ordering, the bf16 attn rounding feeding the MXU, and the
    # approximate EUP reciprocal in the softmax -> loose tolerance.
    q_q = queries.astype(jnp.bfloat16).astype(jnp.float32)
    k_q = keys.astype(jnp.bfloat16).astype(jnp.float32)
    v_q = values.astype(jnp.bfloat16).astype(jnp.float32)
    r_q = relations.astype(jnp.bfloat16).astype(jnp.float32)
    w_q = w_t.astype(jnp.bfloat16).astype(jnp.float32)
    ref = kgc_reference(q_q, k_q, v_q, r_q, w_q, bias)
    assert jnp.allclose(out, ref, atol=3e-2, rtol=2e-2), "mismatch vs pure-JAX reference"

    print("KERNEL_OK")
</pallas_src>

<mosaic_0001>
module attributes {stable_mosaic.version = 11 : i64} {
  func.func @kgc_kernel(%arg0: i32, %arg1: memref<32x32xbf16, #tpu.memory_space<vmem>>, %arg2: memref<4x32x32xbf16, #tpu.memory_space<vmem>>, %arg3: memref<32x32xbf16, #tpu.memory_space<vmem>>, %arg4: memref<4x32x32xbf16, #tpu.memory_space<vmem>>, %arg5: memref<64x32xbf16, #tpu.memory_space<vmem>>, %arg6: memref<1x32xf32, #tpu.memory_space<vmem>>, %arg7: memref<32x32xf32, #tpu.memory_space<vmem>>) attributes {dimension_semantics = [#tpu.dimension_semantics<parallel>], iteration_bounds = array<i64: 2>, scalar_prefetch = 0 : i64, scratch_operands = 0 : i64, tpu.core_type = #tpu.core_type<tc>, window_params = [{transform_indices = @transform_0, window_bounds = array<i64: 32, 32>}, {transform_indices = @transform_1, window_bounds = array<i64: 4, 32, 32>}, {transform_indices = @transform_2, window_bounds = array<i64: 32, 32>}, {transform_indices = @transform_3, window_bounds = array<i64: 4, 32, 32>}, {pipeline_mode = #tpu.pipeline_mode<synchronous>, transform_indices = @transform_4, window_bounds = array<i64: 64, 32>}, {pipeline_mode = #tpu.pipeline_mode<synchronous>, transform_indices = @transform_5, window_bounds = array<i64: 1, 32>}, {transform_indices = @transform_6, window_bounds = array<i64: 32, 32>}]} {
    %c0 = arith.constant 0 : index
    %c0_0 = arith.constant 0 : index
    %0 = vector.load %arg1[%c0, %c0_0] : memref<32x32xbf16, #tpu.memory_space<vmem>>, vector<32x32xbf16>
    %1 = arith.extf %0 : vector<32x32xbf16> to vector<32x32xf32>
    %c0_1 = arith.constant 0 : index
    %c0_2 = arith.constant 0 : index
    %c0_3 = arith.constant 0 : index
    %2 = vector.load %arg4[%c0_1, %c0_2, %c0_3] : memref<4x32x32xbf16, #tpu.memory_space<vmem>>, vector<1x32x32xbf16>
    %3 = vector.shape_cast %2 : vector<1x32x32xbf16> to vector<32x32xbf16>
    %4 = arith.extf %3 : vector<32x32xbf16> to vector<32x32xf32>
    %5 = arith.mulf %1, %4 : vector<32x32xf32>
    %cst = arith.constant dense<0.000000e+00> : vector<32xf32>
    %6 = vector.multi_reduction <add>, %5, %cst [1] : vector<32x32xf32> to vector<32xf32>
    %7 = vector.shape_cast %6 : vector<32xf32> to vector<32x1xf32>
    %c1 = arith.constant 1 : index
    %c0_4 = arith.constant 0 : index
    %c0_5 = arith.constant 0 : index
    %8 = vector.load %arg4[%c1, %c0_4, %c0_5] : memref<4x32x32xbf16, #tpu.memory_space<vmem>>, vector<1x32x32xbf16>
    %9 = vector.shape_cast %8 : vector<1x32x32xbf16> to vector<32x32xbf16>
    %10 = arith.extf %9 : vector<32x32xbf16> to vector<32x32xf32>
    %11 = arith.mulf %1, %10 : vector<32x32xf32>
    %cst_6 = arith.constant dense<0.000000e+00> : vector<32xf32>
    %12 = vector.multi_reduction <add>, %11, %cst_6 [1] : vector<32x32xf32> to vector<32xf32>
    %13 = vector.shape_cast %12 : vector<32xf32> to vector<32x1xf32>
    %c2 = arith.constant 2 : index
    %c0_7 = arith.constant 0 : index
    %c0_8 = arith.constant 0 : index
    %14 = vector.load %arg4[%c2, %c0_7, %c0_8] : memref<4x32x32xbf16, #tpu.memory_space<vmem>>, vector<1x32x32xbf16>
    %15 = vector.shape_cast %14 : vector<1x32x32xbf16> to vector<32x32xbf16>
    %16 = arith.extf %15 : vector<32x32xbf16> to vector<32x32xf32>
    %17 = arith.mulf %1, %16 : vector<32x32xf32>
    %cst_9 = arith.constant dense<0.000000e+00> : vector<32xf32>
    %18 = vector.multi_reduction <add>, %17, %cst_9 [1] : vector<32x32xf32> to vector<32xf32>
    %19 = vector.shape_cast %18 : vector<32xf32> to vector<32x1xf32>
    %c3 = arith.constant 3 : index
    %c0_10 = arith.constant 0 : index
    %c0_11 = arith.constant 0 : index
    %20 = vector.load %arg4[%c3, %c0_10, %c0_11] : memref<4x32x32xbf16, #tpu.memory_space<vmem>>, vector<1x32x32xbf16>
    %21 = vector.shape_cast %20 : vector<1x32x32xbf16> to vector<32x32xbf16>
    %22 = arith.extf %21 : vector<32x32xbf16> to vector<32x32xf32>
    %23 = arith.mulf %1, %22 : vector<32x32xf32>
    %cst_12 = arith.constant dense<0.000000e+00> : vector<32xf32>
    %24 = vector.multi_reduction <add>, %23, %cst_12 [1] : vector<32x32xf32> to vector<32xf32>
    %25 = vector.shape_cast %24 : vector<32xf32> to vector<32x1xf32>
    %26 = arith.maximumf %7, %13 : vector<32x1xf32>
    %27 = arith.maximumf %26, %19 : vector<32x1xf32>
    %28 = arith.maximumf %27, %25 : vector<32x1xf32>
    %29 = arith.subf %7, %28 : vector<32x1xf32>
    %30 = math.exp %29 : vector<32x1xf32>
    %31 = arith.subf %13, %28 : vector<32x1xf32>
    %32 = math.exp %31 : vector<32x1xf32>
    %33 = arith.subf %19, %28 : vector<32x1xf32>
    %34 = math.exp %33 : vector<32x1xf32>
    %35 = arith.subf %25, %28 : vector<32x1xf32>
    %36 = math.exp %35 : vector<32x1xf32>
    %37 = arith.addf %30, %32 : vector<32x1xf32>
    %38 = arith.addf %37, %34 : vector<32x1xf32>
    %39 = arith.addf %38, %36 : vector<32x1xf32>
    %40 = tpu.reciprocal %39 {approx = true} : vector<32x1xf32> -> vector<32x1xf32>
    %c0_13 = arith.constant 0 : index
    %c0_14 = arith.constant 0 : index
    %c0_15 = arith.constant 0 : index
    %41 = vector.load %arg2[%c0_13, %c0_14, %c0_15] : memref<4x32x32xbf16, #tpu.memory_space<vmem>>, vector<1x32x32xbf16>
    %42 = vector.shape_cast %41 : vector<1x32x32xbf16> to vector<32x32xbf16>
    %43 = arith.extf %42 : vector<32x32xbf16> to vector<32x32xf32>
    %44 = vector.broadcast %30 : vector<32x1xf32> to vector<32x32xf32>
    %45 = arith.mulf %44, %43 : vector<32x32xf32>
    %c1_16 = arith.constant 1 : index
    %c0_17 = arith.constant 0 : index
    %c0_18 = arith.constant 0 : index
    %46 = vector.load %arg2[%c1_16, %c0_17, %c0_18] : memref<4x32x32xbf16, #tpu.memory_space<vmem>>, vector<1x32x32xbf16>
    %47 = vector.shape_cast %46 : vector<1x32x32xbf16> to vector<32x32xbf16>
    %48 = arith.extf %47 : vector<32x32xbf16> to vector<32x32xf32>
    %49 = vector.broadcast %32 : vector<32x1xf32> to vector<32x32xf32>
    %50 = arith.mulf %49, %48 : vector<32x32xf32>
    %51 = arith.addf %45, %50 : vector<32x32xf32>
    %c2_19 = arith.constant 2 : index
    %c0_20 = arith.constant 0 : index
    %c0_21 = arith.constant 0 : index
    %52 = vector.load %arg2[%c2_19, %c0_20, %c0_21] : memref<4x32x32xbf16, #tpu.memory_space<vmem>>, vector<1x32x32xbf16>
    %53 = vector.shape_cast %52 : vector<1x32x32xbf16> to vector<32x32xbf16>
    %54 = arith.extf %53 : vector<32x32xbf16> to vector<32x32xf32>
    %55 = vector.broadcast %34 : vector<32x1xf32> to vector<32x32xf32>
    %56 = arith.mulf %55, %54 : vector<32x32xf32>
    %57 = arith.addf %51, %56 : vector<32x32xf32>
    %c3_22 = arith.constant 3 : index
    %c0_23 = arith.constant 0 : index
    %c0_24 = arith.constant 0 : index
    %58 = vector.load %arg2[%c3_22, %c0_23, %c0_24] : memref<4x32x32xbf16, #tpu.memory_space<vmem>>, vector<1x32x32xbf16>
    %59 = vector.shape_cast %58 : vector<1x32x32xbf16> to vector<32x32xbf16>
    %60 = arith.extf %59 : vector<32x32xbf16> to vector<32x32xf32>
    %61 = vector.broadcast %36 : vector<32x1xf32> to vector<32x32xf32>
    %62 = arith.mulf %61, %60 : vector<32x32xf32>
    %63 = arith.addf %57, %62 : vector<32x32xf32>
    %64 = vector.broadcast %40 : vector<32x1xf32> to vector<32x32xf32>
    %65 = arith.mulf %63, %64 : vector<32x32xf32>
    %66 = arith.truncf %65 : vector<32x32xf32> to vector<32x32xbf16>
    %c0_25 = arith.constant 0 : index
    %c0_26 = arith.constant 0 : index
    %67 = vector.load %arg5[%c0_25, %c0_26] : memref<64x32xbf16, #tpu.memory_space<vmem>>, vector<32x32xbf16>
    %cst_27 = arith.constant dense<0.000000e+00> : vector<32x32xf32>
    %68 = tpu.matmul %66, %67, %cst_27 {dimension_numbers = #tpu.dot_dimension_numbers<[1], [0], [0], [1], [0, 0, 1, 1], [], []>} : vector<32x32xbf16>, vector<32x32xbf16>, vector<32x32xf32> -> vector<32x32xf32>
    %c0_28 = arith.constant 0 : index
    %c0_29 = arith.constant 0 : index
    %69 = vector.load %arg3[%c0_28, %c0_29] : memref<32x32xbf16, #tpu.memory_space<vmem>>, vector<32x32xbf16>
    %c32 = arith.constant 32 : index
    %c0_30 = arith.constant 0 : index
    %70 = vector.load %arg5[%c32, %c0_30] : memref<64x32xbf16, #tpu.memory_space<vmem>>, vector<32x32xbf16>
    %cst_31 = arith.constant dense<0.000000e+00> : vector<32x32xf32>
    %71 = tpu.matmul %69, %70, %cst_31 {dimension_numbers = #tpu.dot_dimension_numbers<[1], [0], [0], [1], [0, 0, 1, 1], [], []>} : vector<32x32xbf16>, vector<32x32xbf16>, vector<32x32xf32> -> vector<32x32xf32>
    %72 = arith.addf %68, %71 : vector<32x32xf32>
    %c0_32 = arith.constant 0 : index
    %c0_33 = arith.constant 0 : index
    %73 = vector.load %arg6[%c0_32, %c0_33] : memref<1x32xf32, #tpu.memory_space<vmem>>, vector<1x32xf32>
    %74 = vector.broadcast %73 : vector<1x32xf32> to vector<32x32xf32>
    %75 = arith.addf %72, %74 : vector<32x32xf32>
    %cst_34 = arith.constant 0.000000e+00 : f32
    %76 = vector.broadcast %cst_34 : f32 to vector<32x32xf32>
    %77 = arith.maximumf %75, %76 : vector<32x32xf32>
    %c0_35 = arith.constant 0 : index
    %c0_36 = arith.constant 0 : index
    %78 = vector.load %arg7[%c0_35, %c0_36] : memref<32x32xf32, #tpu.memory_space<vmem>>, vector<32x32xf32>
    tpu.vector_store %arg7[%c0_35, %c0_36], %77 {strides = array<i32>} : memref<32x32xf32, #tpu.memory_space<vmem>>, vector<32x32xf32>,
    return
  }
  func.func @transform_0(%arg0: i32) -> (i32, i32) {
    %c0_i32 = arith.constant 0 : i32
    %c0_i32_0 = arith.constant 0 : i32
    return %arg0, %c0_i32 : i32, i32
  }
  func.func @transform_1(%arg0: i32) -> (i32, i32, i32) {
    %c0_i32 = arith.constant 0 : i32
    %c0_i32_0 = arith.constant 0 : i32
    %c0_i32_1 = arith.constant 0 : i32
    return %c0_i32, %arg0, %c0_i32_0 : i32, i32, i32
  }
  func.func @transform_2(%arg0: i32) -> (i32, i32) {
    %c0_i32 = arith.constant 0 : i32
    %c0_i32_0 = arith.constant 0 : i32
    return %arg0, %c0_i32 : i32, i32
  }
  func.func @transform_3(%arg0: i32) -> (i32, i32, i32) {
    %c0_i32 = arith.constant 0 : i32
    %c0_i32_0 = arith.constant 0 : i32
    %c0_i32_1 = arith.constant 0 : i32
    return %c0_i32, %arg0, %c0_i32_0 : i32, i32, i32
  }
  func.func @transform_4(%arg0: i32) -> (i32, i32) {
    %c0_i32 = arith.constant 0 : i32
    %c0_i32_0 = arith.constant 0 : i32
    %c0_i32_1 = arith.constant 0 : i32
    return %c0_i32, %c0_i32_0 : i32, i32
  }
  func.func @transform_5(%arg0: i32) -> (i32, i32) {
    %c0_i32 = arith.constant 0 : i32
    %c0_i32_0 = arith.constant 0 : i32
    %c0_i32_1 = arith.constant 0 : i32
    return %c0_i32, %c0_i32_0 : i32, i32
  }
  func.func @transform_6(%arg0: i32) -> (i32, i32) {
    %c0_i32 = arith.constant 0 : i32
    %c0_i32_0 = arith.constant 0 : i32
    return %arg0, %c0_i32 : i32, i32
  }
}

</mosaic_0001>

<bundles_post_ra>
// kernel: tpu_custom_call.1
= control target key start
LH: loop header
LB: loop body
LE: loop exit
PB: predicated region body
PF: predicated region fallthrough
CT: control target
= control target key end

     0   :  { %s1358_s21 = smov 0   ;;  %s1360_s22 = smov 0   ;;  %s1504_s0 = inlined_call_operand.vmem [shape: bf16[64,32], index: 0, kind: input, shape index: {}]   ;;  %s1505_s1 = inlined_call_operand.vmem [shape: bf16[4,64,32], index: 1, kind: input, shape index: {}]   ;;  %s1506_s2 = inlined_call_operand.vmem [shape: bf16[64,32], index: 2, kind: input, shape index: {}]   ;;  %s1507_s3 = inlined_call_operand.vmem [shape: bf16[4,64,32], index: 3, kind: input, shape index: {}]   ;;  %s1508_s4 = inlined_call_operand.vmem [shape: bf16[64,32], index: 4, kind: input, shape index: {}]   ;;  %s1509_s5 = inlined_call_operand.vmem [shape: f32[1,32], index: 5, kind: input, shape index: {}]   ;;  %s1510_s6 = inlined_call_operand.vmem [shape: f32[64,32], index: 6, kind: output, shape index: {}]  }
   0x1   :  { %s1362_s23 = smov 0  }
   0x2 LB: > { %s1056_s24 = sadd.s32 4294967295, %s1321_s23   ;;  %s1375_s25 = sadd.s32 1, %s1321_s23   ;;  %s1321_s23 = sphi %s1362_s23, %s1514_s23   ;;  %s1317_s22 = sphi %s1360_s22, %s1513_s22   ;;  %s1313_s21 = sphi %s1358_s21, %s1512_s21  }
   0x3   : > { %s46_s26 = ssub.s32 %s1321_s23, %s1375_s25  ;;  %s49_s27 = sadd.s32 1, %s1317_s22 }
   0x4   : > { %p47_p0 = scmp.eq.s32.totalorder %s46_s26, 0  ;;  %p56_p1 = scmp.ne.s32.totalorder %s1317_s22, %s1313_s21 }
   0x5   : > { %p57_p2 = scmp.eq.s32.totalorder %s1321_s23, 0  ;;  %p1059_p4 = scmp.ge.s32.totalorder %s1321_s23, 2 }
   0x6   : > { %s1384_s28 = scalar_select %p47_p0, %s1317_s22, %s49_s27  }
   0x7   : > { %p1386_p3 = por %p57_p2, %p56_p1  ;;  %208 = sbr.rel (%p1059_p4) target bundleno = 30 (0x1e), region = 24 }
   0xe   : > { %220 = sbr.rel (!%p1386_p3) target bundleno = 22 (0x16), region = 32  ;;  %s222_s30 = sand.u32 (%p1386_p3), 1, %s1317_s22  }
   0xf   : > { %s1112_s7 = sshll.u32 (%p1386_p3), %s1321_s23, 4  ;;  %s1060_s8 = sshll.u32 (%p1386_p3), %s222_s30, 6 }
  0x10   : > { %s227_s11 = scalar_lea.vmem (%p1386_p3), %s1505_s1, %s1112_s7  ;;  %s224_s12 = scalar_lea.vmem (%p1386_p3), [#allocation2], %s1060_s8 }
  0x11   : > { %v243_v0 = vld [vmem:[%s227_s11] sm:$0xff] (%p1386_p3)   ;;  %v247_v1 = vld [vmem:[%s227_s11 + $0x8] sm:$0xff] (%p1386_p3)  }
  0x12   : > { %v251_v2 = vld [vmem:[%s227_s11 + $0x20] sm:$0xff] (%p1386_p3)   ;;  %244 = vst [vmem:[%s224_s12] sm:$0xff] (%p1386_p3), %v243_v0   ;;  %248 = vst [vmem:[%s224_s12 + $0x8] sm:$0xff] (%p1386_p3), %v247_v1   ;;  %v255_v3 = vld [vmem:[%s227_s11 + $0x28] sm:$0xff] (%p1386_p3)  }
  0x13   : > { %252 = vst [vmem:[%s224_s12 + $0x10] sm:$0xff] (%p1386_p3), %v251_v2   ;;  %v259_v4 = vld [vmem:[%s227_s11 + $0x40] sm:$0xff] (%p1386_p3)   ;;  %v263_v5 = vld [vmem:[%s227_s11 + $0x48] sm:$0xff] (%p1386_p3)   ;;  %256 = vst [vmem:[%s224_s12 + $0x18] sm:$0xff] (%p1386_p3), %v255_v3  }
  0x14   : > { %260 = vst [vmem:[%s224_s12 + $0x20] sm:$0xff] (%p1386_p3), %v259_v4   ;;  %264 = vst [vmem:[%s224_s12 + $0x28] sm:$0xff] (%p1386_p3), %v263_v5   ;;  %v267_v6 = vld [vmem:[%s227_s11 + $0x60] sm:$0xff] (%p1386_p3)   ;;  %v271_v7 = vld [vmem:[%s227_s11 + $0x68] sm:$0xff] (%p1386_p3)  }
  0x15   : > { %268 = vst [vmem:[%s224_s12 + $0x30] sm:$0xff] %v267_v6   ;;  %272 = vst [vmem:[%s224_s12 + $0x38] sm:$0xff] %v271_v7  }
  0x16 PF: > { %338 = sbr.rel (!%p1386_p3) target bundleno = 30 (0x1e), region = 77  ;;  %s340_s13 = sand.u32 (%p1386_p3), 1, %s1317_s22  }
  0x17   : > { %s1113_s14 = sshll.u32 (%p1386_p3), %s1321_s23, 4  ;;  %s1063_s15 = sshll.u32 (%p1386_p3), %s340_s13, 6 }
  0x18   : > { %s345_s18 = scalar_lea.vmem (%p1386_p3), %s1507_s3, %s1113_s14  ;;  %s342_s19 = scalar_lea.vmem (%p1386_p3), [#allocation3], %s1063_s15 }
  0x19   : > { %v361_v8 = vld [vmem:[%s345_s18] sm:$0xff] (%p1386_p3)   ;;  %v365_v9 = vld [vmem:[%s345_s18 + $0x8] sm:$0xff] (%p1386_p3)  }
  0x1a   : > { %v369_v10 = vld [vmem:[%s345_s18 + $0x20] sm:$0xff] (%p1386_p3)   ;;  %362 = vst [vmem:[%s342_s19] sm:$0xff] (%p1386_p3), %v361_v8   ;;  %366 = vst [vmem:[%s342_s19 + $0x8] sm:$0xff] (%p1386_p3), %v365_v9   ;;  %v373_v11 = vld [vmem:[%s345_s18 + $0x28] sm:$0xff] (%p1386_p3)  }
  0x1b   : > { %370 = vst [vmem:[%s342_s19 + $0x10] sm:$0xff] (%p1386_p3), %v369_v10   ;;  %v377_v12 = vld [vmem:[%s345_s18 + $0x40] sm:$0xff] (%p1386_p3)   ;;  %v381_v13 = vld [vmem:[%s345_s18 + $0x48] sm:$0xff] (%p1386_p3)   ;;  %374 = vst [vmem:[%s342_s19 + $0x18] sm:$0xff] (%p1386_p3), %v373_v11  }
  0x1c   : > { %378 = vst [vmem:[%s342_s19 + $0x20] sm:$0xff] (%p1386_p3), %v377_v12   ;;  %382 = vst [vmem:[%s342_s19 + $0x28] sm:$0xff] (%p1386_p3), %v381_v13   ;;  %v385_v14 = vld [vmem:[%s345_s18 + $0x60] sm:$0xff] (%p1386_p3)   ;;  %v389_v15 = vld [vmem:[%s345_s18 + $0x68] sm:$0xff] (%p1386_p3)  }
  0x1d   : > { %386 = vst [vmem:[%s342_s19 + $0x30] sm:$0xff] %v385_v14   ;;  %390 = vst [vmem:[%s342_s19 + $0x38] sm:$0xff] %v389_v15  }
  0x1e PF: > { %p1066_p5 = scmp.ge.s32.totalorder %s1321_s23, 1  ;;  %p446_p6 = scmp.lt.s32.totalorder %s1321_s23, 3 }
  0x20   : > { %p447_p7 = pnand %p1066_p5, %p446_p6 }
  0x21   : > { %s453_s20 = sand.u32 (!%p447_p7), 1, %s1313_s21   ;;  %s1069_s26 = sshll.u32 (!%p447_p7), %s1056_s24, 2  ;;  %vm544_vm0 = vcmask (!%p447_p7), 261120   ;;  %v1253_v14 = vld [vmem:[%s1508_s4 + $0x10] sm:$0xff] (!%p447_p7)   ;;  %v1254_v15 = vld [vmem:[%s1508_s4] sm:$0xff] (!%p447_p7)  }
  0x22   : > { %450 = sbr.rel (%p447_p7) target bundleno = 489 (0x1e9), region = 118  ;;  %s1410_s27 = sshll.u32 (!%p447_p7), %s453_s20, 6  ;;  %1209 = vmatprep.subr.bf16.mxu1 (!%p447_p7), %v1253_v14  ;;  %1217 = vmatprep.subr.bf16.mxu0 (!%p447_p7), %v1254_v15 }
  0x23   : > { %p504_p8 = scmp.lt.s32.totalorder (!%p447_p7), %s1069_s26, 7  ;;  %s1415_s29 = scalar_lea.vmem (!%p447_p7), [#allocation3], %s1410_s27  ;;  %1210 = vmatpush3.bf16.msra.mxu1 (!%p447_p7), %v1253_v14  ;;  %1218 = vmatpush3.bf16.msra.mxu0 (!%p447_p7), %v1254_v15 }
  0x24   : > { %v1188_v16 = vld [vmem:[%s1415_s29 + $0x10] sm:$0xff] (!%p447_p7)   ;;  %v1123_v17 = vld [vmem:[%s1415_s29] sm:$0xff] (!%p447_p7)   ;;  %v1187_v22 = vld [vmem:[%s1415_s29 + $0x8] sm:$0xff] (!%p447_p7)   ;;  %s1471_s18 = scalar_lea.vmem (!%p447_p7), [#allocation2], %s1410_s27 }
  0x25   : > { %v1132_v18 = vunpack.c.l.bf16 (!%p447_p7), %v1188_v16  ;;  %v1124_v19 = vunpack.c.l.bf16 (!%p447_p7), %v1123_v17  ;;  %v1133_v20 = vunpack.c.h.bf16 (!%p447_p7), %v1188_v16  ;;  %v1125_v21 = vunpack.c.h.bf16 (!%p447_p7), %v1123_v17  ;;  %v1189_v35 = vld [vmem:[%s1415_s29 + $0x18] sm:$0xff] (!%p447_p7)   ;;  %v1190_v44 = vld [vmem:[%s1415_s29 + $0x20] sm:$0xff] (!%p447_p7)   ;;  %v1191_v51 = vld [vmem:[%s1415_s29 + $0x28] sm:$0xff] (!%p447_p7)  }
  0x26   : > { %v1129_v28 = vunpack.c.h.bf16 (!%p447_p7), %v1187_v22  ;;  %v1128_v30 = vunpack.c.l.bf16 (!%p447_p7), %v1187_v22  ;;  %v1137_v38 = vunpack.c.h.bf16 (!%p447_p7), %v1189_v35  ;;  %v1136_v39 = vunpack.c.l.bf16 (!%p447_p7), %v1189_v35  ;;  %v1192_v58 = vld [vmem:[%s1415_s29 + $0x30] sm:$0xff] (!%p447_p7)   ;;  %v1193_v1 = vld [vmem:[%s1415_s29 + $0x38] sm:$0xff] (!%p447_p7)   ;;  %v1155_v15 = vld [vmem:[%s1471_s18] sm:$0xff] (!%p447_p7)  }
  0x27   : > { %v1141_v45 = vunpack.c.h.bf16 (!%p447_p7), %v1190_v44  ;;  %v1140_v46 = vunpack.c.l.bf16 (!%p447_p7), %v1190_v44  ;;  %v1145_v52 = vunpack.c.h.bf16 (!%p447_p7), %v1191_v51  ;;  %v1144_v53 = vunpack.c.l.bf16 (!%p447_p7), %v1191_v51  ;;  %v1255_v16 = vld [vmem:[%s1508_s4 + $0x18] sm:$0xff] (!%p447_p7)  }
  0x28   : > { %v1149_v59 = vunpack.c.h.bf16 (!%p447_p7), %v1192_v58  ;;  %v1148_v60 = vunpack.c.l.bf16 (!%p447_p7), %v1192_v58  ;;  %v1153_v2 = vunpack.c.h.bf16 (!%p447_p7), %v1193_v1  ;;  %v1152_v3 = vunpack.c.l.bf16 (!%p447_p7), %v1193_v1  ;;  %1211 = vmatprep.subr.bf16.mxu1 (!%p447_p7), %v1255_v16 }
  0x29   : > { %s1516_s26 = smov (!%p504_p8, %s1069_s26), 7  ;;  %1212 = vmatpush3.bf16.msra.mxu1 %v1255_v16  ;;  %v1195_v16 = vld [vmem:[%s1471_s18 + $0x10] sm:$0xff]  }
  0x2a   : > { %s1070_s30 = sshll.u32 %s1516_s26, 2  ;;  %s1074_s27 = sshll.u32 %s1516_s26, 3 }
  0x2b   : > { %s507_s24 = scalar_lea.vmem %s1504_s0, %s1070_s30  ;;  %s514_s15 = scalar_lea.vmem %s1506_s2, %s1070_s30 }
  0x2c   : > { %v1115_v23 = vld [vmem:[%s507_s24] sm:$0xff]   ;;  %v1186_v24 = vld [vmem:[%s507_s24 + $0x8] sm:$0xff]   ;;  %s521_s21 = scalar_lea.vmem %s1510_s6, %s1074_s27 }
  0x2d   : > { %v1116_v25 = vunpack.c.l.bf16 %v1115_v23  ;;  %v1117_v26 = vunpack.c.h.bf16 %v1115_v23  ;;  %v1121_v27 = vunpack.c.h.bf16 %v1186_v24  ;;  %v1120_v29 = vunpack.c.l.bf16 %v1186_v24  ;;  %v1256_v17 = vld [vmem:[%s514_s15] sm:$0xff]  }
  0x2e   : > { %1213 = vmatprep.mubr.msk.bf16.mxu1 %vm544_vm0, %v1256_v17 }
  0x2f   : > { %v566_v31 = vmul.f32 %v1132_v18, %v1116_v25  ;;  %v540_v32 = vmul.f32 %v1124_v19, %v1116_v25  ;;  %v567_v33 = vmul.f32 %v1133_v20, %v1117_v26  ;;  %v541_v34 = vmul.f32 %v1125_v21, %v1117_v26  ;;  %v1257_v18 = vld [vmem:[%s1508_s4 + $0x8] sm:$0xff]  }
  0x30   : > { %v543_v42 = vmul.f32 %v1129_v28, %v1121_v27  ;;  %v542_v43 = vmul.f32 %v1128_v30, %v1120_v29  ;;  %v569_v49 = vmul.f32 %v1137_v38, %v1121_v27  ;;  %v568_v50 = vmul.f32 %v1136_v39, %v1120_v29  ;;  %1219 = vmatprep.subr.bf16.mxu0 %v1257_v18  ;;  %v1258_v19 = vld [vmem:[%s514_s15 + $0x8] sm:$0xff]  }
  0x31   : > { %v570_v36 = vsel %vm544_vm0, %v566_v31, 0.0  ;;  %v545_v37 = vsel %vm544_vm0, %v540_v32, 0.0  ;;  %v573_v40 = vsel %vm544_vm0, %v567_v33, 0.0  ;;  %v548_v41 = vsel %vm544_vm0, %v541_v34, 0.0  ;;  %1220 = vmatpush3.bf16.msra.mxu0 %v1257_v18  ;;  %1214 = vmatmul.mubr.msk.bf16.vlgmr.msra.gmra.mrb[0].mxu1 %vm544_vm0, %v1258_v19 }
  0x32   : > { %571 = vadd.xlane.f32.xlu1 %v570_v36  ;;  %546 = vadd.xlane.f32.xlu0 %v545_v37  ;;  %v554_v47 = vsel %vm544_vm0, %v543_v42, 0.0  ;;  %v551_v48 = vsel %vm544_vm0, %v542_v43, 0.0  ;;  %v579_v54 = vsel %vm544_vm0, %v569_v49, 0.0  ;;  %v576_v55 = vsel %vm544_vm0, %v568_v50, 0.0 }
  0x33   : > { %v592_v56 = vmul.f32 %v1141_v45, %v1117_v26  ;;  %v591_v57 = vmul.f32 %v1140_v46, %v1116_v25  ;;  %v594_v63 = vmul.f32 %v1145_v52, %v1121_v27  ;;  %v593_v0 = vmul.f32 %v1144_v53, %v1120_v29 }
  0x34   : > { %v617_v6 = vmul.f32 %v1149_v59, %v1117_v26  ;;  %v616_v7 = vmul.f32 %v1148_v60, %v1116_v25  ;;  %v619_v10 = vmul.f32 %v1153_v2, %v1121_v27  ;;  %v618_v11 = vmul.f32 %v1152_v3, %v1120_v29 }
  0x35   : > { %v598_v61 = vsel %vm544_vm0, %v592_v56, 0.0  ;;  %v595_v62 = vsel %vm544_vm0, %v591_v57, 0.0  ;;  %v604_v4 = vsel %vm544_vm0, %v594_v63, 0.0  ;;  %v601_v5 = vsel %vm544_vm0, %v593_v0, 0.0 }
  0x36   : > { %574 = vadd.xlane.f32.xlu1 %v573_v40  ;;  %549 = vadd.xlane.f32.xlu0 %v548_v41  ;;  %v623_v8 = vsel %vm544_vm0, %v617_v6, 0.0  ;;  %v620_v9 = vsel %vm544_vm0, %v616_v7, 0.0  ;;  %v629_v12 = vsel %vm544_vm0, %v619_v10, 0.0  ;;  %v626_v13 = vsel %vm544_vm0, %v618_v11, 0.0 }
  0x3a   : > { %555 = vadd.xlane.f32.xlu1 %v554_v47  ;;  %552 = vadd.xlane.f32.xlu0 %v551_v48 }
  0x3e   : > { %580 = vadd.xlane.f32.xlu1 %v579_v54  ;;  %577 = vadd.xlane.f32.xlu0 %v576_v55 }
  0x42   : > { %599 = vadd.xlane.f32.xlu1 %v598_v61  ;;  %596 = vadd.xlane.f32.xlu0 %v595_v62 }
  0x46   : > { %605 = vadd.xlane.f32.xlu1 %v604_v4  ;;  %602 = vadd.xlane.f32.xlu0 %v601_v5 }
  0x4a   : > { %624 = vadd.xlane.f32.xlu1 %v623_v8  ;;  %621 = vadd.xlane.f32.xlu0 %v620_v9 }
  0x4e   : > { %630 = vadd.xlane.f32.xlu1 %v629_v12  ;;  %627 = vadd.xlane.f32.xlu0 %v626_v13 }
  0xbf   : > { %v572_v20 = vpop.xlane.xlu1 %571  ;;  %v547_v21 = vpop.xlane.xlu0 %546 }
  0xc0   : > { %v632_v32 = vmax.f32 %v547_v21, %v572_v20 }
  0xc3   : > { %v575_v22 = vpop.xlane.xlu1 %574  ;;  %v550_v23 = vpop.xlane.xlu0 %549 }
  0xc4   : > { %v633_v33 = vmax.f32 %v550_v23, %v575_v22 }
  0xc7   : > { %v556_v24 = vpop.xlane.xlu1 %555  ;;  %v553_v25 = vpop.xlane.xlu0 %552 }
  0xcb   : > { %v581_v26 = vpop.xlane.xlu1 %580  ;;  %v578_v27 = vpop.xlane.xlu0 %577 }
  0xcc   : > { %v635_v36 = vmax.f32 %v556_v24, %v581_v26  ;;  %v634_v41 = vmax.f32 %v553_v25, %v578_v27 }
  0xcf   : > { %v600_v28 = vpop.xlane.xlu1 %599  ;;  %v597_v29 = vpop.xlane.xlu0 %596 }
  0xd0   : > { %v637_v34 = vmax.f32 %v633_v33, %v600_v28  ;;  %v636_v35 = vmax.f32 %v632_v32, %v597_v29  ;;  %v1197_v33 = vld [vmem:[%s1471_s18 + $0x20] sm:$0xff]  }
  0xd3   : > { %v606_v30 = vpop.xlane.xlu1 %605  ;;  %v1466_v31 = vpop.xlane.xlu0 %602 }
  0xd4   : > { %v639_v42 = vmax.f32 %v635_v36, %v606_v30  ;;  %v638_v47 = vmax.f32 %v634_v41, %v1466_v31 }
  0xd7   : > { %v625_v37 = vpop.xlane.xlu1 %624  ;;  %v622_v38 = vpop.xlane.xlu0 %621 }
  0xd8   : > { %v641_v39 = vmax.f32 %v637_v34, %v625_v37  ;;  %v640_v40 = vmax.f32 %v636_v35, %v622_v38 }
  0xda   : > { %v645_v43 = vsub.f32 %v550_v23, %v641_v39  ;;  %v657_v44 = vsub.f32 %v575_v22, %v641_v39  ;;  %v669_v45 = vsub.f32 %v600_v28, %v641_v39  ;;  %v681_v46 = vsub.f32 %v625_v37, %v641_v39  ;;  %v1194_v39 = vld [vmem:[%s1471_s18 + $0x8] sm:$0xff]  }
  0xdb   : > { %v644_v48 = vsub.f32 %v547_v21, %v640_v40  ;;  %v656_v49 = vsub.f32 %v572_v20, %v640_v40  ;;  %v668_v50 = vsub.f32 %v597_v29, %v640_v40  ;;  %v631_v51 = vpop.xlane.xlu1 %630  ;;  %v628_v52 = vpop.xlane.xlu0 %627  ;;  %v680_v58 = vsub.f32 %v622_v38, %v640_v40  ;;  %v1196_v40 = vld [vmem:[%s1471_s18 + $0x18] sm:$0xff]  }
  0xdc   : > { %v650_v53 = vmul.f32 1.442695, %v645_v43  ;;  %v662_v54 = vmul.f32 1.442695, %v657_v44  ;;  %v674_v55 = vmul.f32 1.442695, %v669_v45  ;;  %v643_v56 = vmax.f32 %v639_v42, %v631_v51 }
  0xdd   : > { %v686_v57 = vmul.f32 1.442695, %v681_v46  ;;  %v648_v59 = vmul.f32 1.442695, %v644_v48  ;;  %v642_v61 = vmax.f32 %v638_v47, %v628_v52  ;;  %v660_v62 = vmul.f32 1.442695, %v656_v49 }
  0xde   : > { %1259 = vpow2.f32 %v650_v53  ;;  %v647_v60 = vsub.f32 %v556_v24, %v643_v56  ;;  %v659_v63 = vsub.f32 %v581_v26, %v643_v56  ;;  %v672_v0 = vmul.f32 1.442695, %v668_v50  ;;  %v1199_v45 = vld [vmem:[%s1471_s18 + $0x30] sm:$0xff]  }
  0xdf   : > { %1261 = vpow2.f32 %v662_v54  ;;  %v671_v1 = vsub.f32 %v606_v30, %v643_v56  ;;  %v684_v2 = vmul.f32 1.442695, %v680_v58  ;;  %v683_v3 = vsub.f32 %v631_v51, %v643_v56 }
  0xe0   : > { %1263 = vpow2.f32 %v674_v55  ;;  %v654_v4 = vmul.f32 1.442695, %v647_v60  ;;  %v646_v5 = vsub.f32 %v553_v25, %v642_v61  ;;  %v666_v6 = vmul.f32 1.442695, %v659_v63 }
  0xe1   : > { %1265 = vpow2.f32 %v686_v57  ;;  %v658_v7 = vsub.f32 %v578_v27, %v642_v61  ;;  %v678_v8 = vmul.f32 1.442695, %v671_v1  ;;  %v690_v9 = vmul.f32 1.442695, %v683_v3 }
  0xe2   : > { %1267 = vpow2.f32 %v648_v59  ;;  %v670_v10 = vsub.f32 %v1466_v31, %v642_v61  ;;  %v652_v11 = vmul.f32 1.442695, %v646_v5  ;;  %v682_v13 = vsub.f32 %v628_v52, %v642_v61 }
  0xe3   : > { %1269 = vpow2.f32 %v660_v62  ;;  %v664_v12 = vmul.f32 1.442695, %v658_v7  ;;  %v1157_v23 = vunpack.c.h.bf16 %v1155_v15  ;;  %v1165_v24 = vunpack.c.h.bf16 %v1195_v16  ;;  %v1198_v62 = vld [vmem:[%s1471_s18 + $0x28] sm:$0xff]  }
  0xe4   : > { %1271 = vpow2.f32 %v672_v0  ;;  %v676_v18 = vmul.f32 1.442695, %v670_v10  ;;  %v688_v22 = vmul.f32 1.442695, %v682_v13  ;;  %v1156_v28 = vunpack.c.l.bf16 %v1155_v15  ;;  %v1200_v10 = vld [vmem:[%s1471_s18 + $0x38] sm:$0xff]  }
  0xe5   : > { %1273 = vpow2.f32 %v684_v2  ;;  %v1164_v29 = vunpack.c.l.bf16 %v1195_v16  ;;  %v1173_v44 = vunpack.c.h.bf16 %v1197_v33  ;;  %v1172_v51 = vunpack.c.l.bf16 %v1197_v33 }
  0xe6   : > { %1275 = vpow2.f32 %v654_v4  ;;  %v1161_v52 = vunpack.c.h.bf16 %v1194_v39  ;;  %v1169_v53 = vunpack.c.h.bf16 %v1196_v40  ;;  %v1181_v56 = vunpack.c.h.bf16 %v1199_v45 }
  0xe7   : > { %1277 = vpow2.f32 %v666_v6  ;;  %v1160_v60 = vunpack.c.l.bf16 %v1194_v39  ;;  %v1168_v61 = vunpack.c.l.bf16 %v1196_v40  ;;  %v1180_v1 = vunpack.c.l.bf16 %v1199_v45 }
  0xe8   : > { %v1260_v14 = vpop.eup %1259  ;;  %1279 = vpow2.f32 %v678_v8  ;;  %v1177_v8 = vunpack.c.h.bf16 %v1198_v62 }
  0xe9   : > { %v1262_v17 = vpop.eup %1261  ;;  %1281 = vpow2.f32 %v690_v9  ;;  %v717_v35 = vmul.f32 %v1260_v14, %v1157_v23 }
  0xea   : > { %v1264_v19 = vpop.eup %1263  ;;  %v693_v20 = vadd.f32 %v1262_v17, %v1260_v14  ;;  %1283 = vpow2.f32 %v652_v11  ;;  %v730_v36 = vmul.f32 %v1262_v17, %v1165_v24 }
  0xeb   : > { %v1266_v21 = vpop.eup %1265  ;;  %1285 = vpow2.f32 %v664_v12  ;;  %v747_v59 = vmul.f32 %v1264_v19, %v1173_v44 }
  0xec   : > { %v1268_v25 = vpop.eup %1267  ;;  %v697_v26 = vadd.f32 %v1264_v19, %v693_v20  ;;  %1287 = vpow2.f32 %v676_v18  ;;  %v734_v50 = vadd.f32 %v730_v36, %v717_v35  ;;  %v764_v12 = vmul.f32 %v1266_v21, %v1181_v56 }
  0xed   : > { %v1270_v27 = vpop.eup %1269  ;;  %1289 = vpow2.f32 %v688_v22  ;;  %v716_v42 = vmul.f32 %v1268_v25, %v1156_v28  ;;  %v1176_v20 = vunpack.c.l.bf16 %v1198_v62  ;;  %v1185_v22 = vunpack.c.h.bf16 %v1200_v10 }
  0xee   : > { %v1272_v30 = vpop.eup %1271  ;;  %v701_v31 = vadd.f32 %v1266_v21, %v697_v26  ;;  %v692_v32 = vadd.f32 %v1270_v27, %v1268_v25  ;;  %v729_v43 = vmul.f32 %v1270_v27, %v1164_v29  ;;  %v751_v4 = vadd.f32 %v747_v59, %v734_v50 }
  0xef   : > { %v1274_v34 = vpop.eup %1273  ;;  %v746_v3 = vmul.f32 %v1272_v30, %v1172_v51  ;;  %v1184_v28 = vunpack.c.l.bf16 %v1200_v10 }
  0xf0   : > { %v1276_v37 = vpop.eup %1275  ;;  %1291 = vrcp.f32 %v701_v31  ;;  %v696_v38 = vadd.f32 %v1272_v30, %v692_v32  ;;  %v733_v58 = vadd.f32 %v729_v43, %v716_v42  ;;  %v763_v17 = vmul.f32 %v1274_v34, %v1180_v1 }
  0xf1   : > { %v1278_v41 = vpop.eup %1277  ;;  %v719_v5 = vmul.f32 %v1276_v37, %v1161_v52  ;;  %v768_v18 = vadd.f32 %v764_v12, %v751_v4 }
  0xf2   : > { %v1280_v46 = vpop.eup %1279  ;;  %v700_v47 = vadd.f32 %v1274_v34, %v696_v38  ;;  %v695_v48 = vadd.f32 %v1278_v41, %v1276_v37  ;;  %v732_v6 = vmul.f32 %v1278_v41, %v1169_v53  ;;  %v750_v11 = vadd.f32 %v746_v3, %v733_v58 }
  0xf3   : > { %v1282_v49 = vpop.eup %1281  ;;  %v749_v26 = vmul.f32 %v1280_v46, %v1177_v8 }
  0xf4   : > { %v1284_v54 = vpop.eup %1283  ;;  %1293 = vrcp.f32 %v700_v47  ;;  %v699_v55 = vadd.f32 %v1280_v46, %v695_v48  ;;  %v736_v19 = vadd.f32 %v732_v6, %v719_v5  ;;  %v767_v23 = vadd.f32 %v763_v17, %v750_v11  ;;  %v1109_v48 = vld [vmem:[%s1509_s5] ss:$0 sm:$0xff] }
  0xf5   : > { %v1286_v57 = vpop.eup %1285  ;;  %v718_v13 = vmul.f32 %v1284_v54, %v1160_v60  ;;  %v766_v21 = vmul.f32 %v1282_v49, %v1185_v22 }
  0xf6   : > { %v703_v63 = vadd.f32 %v1282_v49, %v699_v55  ;;  %v694_v0 = vadd.f32 %v1286_v57, %v1284_v54  ;;  %v1288_v2 = vpop.eup %1287  ;;  %v731_v14 = vmul.f32 %v1286_v57, %v1168_v61  ;;  %v753_v31 = vadd.f32 %v749_v26, %v736_v19 }
  0xf7   : > { %v1290_v9 = vpop.eup %1289  ;;  %v748_v30 = vmul.f32 %v1288_v2, %v1176_v20 }
  0xf8   : > { %1295 = vrcp.f32 %v703_v63  ;;  %v698_v7 = vadd.f32 %v1288_v2, %v694_v0  ;;  %v735_v25 = vadd.f32 %v731_v14, %v718_v13  ;;  %v765_v36 = vmul.f32 %v1290_v9, %v1184_v28 }
  0xf9   : > { %v770_v34 = vadd.f32 %v766_v21, %v753_v31 }
  0xfa   : > { %v1292_v15 = vpop.eup %1291  ;;  %v702_v16 = vadd.f32 %v1290_v9, %v698_v7  ;;  %v752_v33 = vadd.f32 %v748_v30, %v735_v25 }
  0xfb   : > { %v772_v24 = vmul.f32 %v1292_v15, %v768_v18 }
  0xfc   : > { %1297 = vrcp.f32 %v702_v16  ;;  %v769_v37 = vadd.f32 %v765_v36, %v752_v33 }
  0xfe   : > { %v1294_v27 = vpop.eup %1293 }
  0xff   : > { %v771_v29 = vmul.f32 %v1294_v27, %v767_v23 }
 0x101   : > { %v775_v32 = vpack.c.bf16 %v772_v24, %v771_v29 }
 0x102   : > { %v1296_v35 = vpop.eup %1295 }
 0x103   : > { %1221 = vmatprep.mubr.msk.bf16.mxu0 %vm544_vm0, %v775_v32  ;;  %v774_v38 = vmul.f32 %v1296_v35, %v770_v34 }
 0x104   : > { %v1215_v42 = vpop.f32.mrb[0].mxu1 }
 0x105   : > { %v851_v43 = vpop.f32.mrb[1].mxu1 }
 0x106   : > { %v1298_v39 = vpop.eup %1297  ;;  %v1216_v44 = vpop.f32.mrb[2].mxu1 }
 0x107   : > { %v773_v40 = vmul.f32 %v1298_v39, %v769_v37  ;;  %v854_v45 = vpop.f32.mrb[3].mxu1 }
 0x109   : > { %v776_v41 = vpack.c.bf16 %v774_v38, %v773_v40 }
 0x10b   : > { %1222 = vmatmul.mubr.msk.bf16.vlgmr.msra.gmra.mrb[0].mxu0 %vm544_vm0, %v776_v41 }
 0x1de   : > { %v1223_v46 = vpop.f32.mrb[0].mxu0 }
 0x1df   : > { %v927_v47 = vadd.f32 %v1223_v46, %v1215_v42  ;;  %v918_v49 = vpop.f32.mrb[1].mxu0 }
 0x1e0   : > { %v919_v50 = vadd.f32 %v918_v49, %v851_v43  ;;  %v1224_v51 = vpop.f32.mrb[2].mxu0 }
 0x1e1   : > { %v930_v52 = vadd.f32 %v1224_v51, %v1216_v44  ;;  %v921_v53 = vpop.f32.mrb[3].mxu0  ;;  %v942_v56 = vadd.f32 %v1109_v48, %v927_v47 }
 0x1e2   : > { %v940_v54 = vadd.f32 %v1109_v48, %v919_v50  ;;  %v922_v55 = vadd.f32 %v921_v53, %v854_v45 }
 0x1e3   : > { %v943_v58 = vadd.f32 %v1109_v48, %v930_v52  ;;  %v946_v61 = vmax.f32 %v942_v56, 0.0 }
 0x1e4   : > { %v944_v57 = vmax.f32 %v940_v54, 0.0  ;;  %v941_v59 = vadd.f32 %v1109_v48, %v922_v55 }
 0x1e5   : > { %v947_v62 = vmax.f32 %v943_v58, 0.0  ;;  %950 = vst.msk [vmem:[%s521_s21 + $0x10] sm:$0xff] %vm544_vm0, %v946_v61 }
 0x1e6   : > { %948 = vst.msk [vmem:[%s521_s21] sm:$0xff] %vm544_vm0, %v944_v57  ;;  %v945_v60 = vmax.f32 %v941_v59, 0.0 }
 0x1e7   : > { %951 = vst.msk [vmem:[%s521_s21 + $0x18] sm:$0xff] %vm544_vm0, %v947_v62 }
 0x1e8   : > { %949 = vst.msk [vmem:[%s521_s21 + $0x8] sm:$0xff] %vm544_vm0, %v945_v60 }
 0x1e9 PF: > { %p13_p9 = scmp.ge.s32.totalorder %s1375_s25, 4   ;;  %s1512_s21 = smov %s1317_s22 }
 0x1ea   : > { %s1513_s22 = smov %s1384_s28  ;;  %s1514_s23 = smov %s1375_s25 }
 0x1eb   :  { %15 = sbr.rel (!%p13_p9) target bundleno = 2 (0x2), region = 181 }

</bundles_post_ra>
